<compile_context>
chip_gen: v6e
topology: v6e:2x2x1
jax: 0.10.0
libtpu: 0.0.40
codegen_flags: <defaults>
</compile_context>

<pallas_src>
import functools

import jax
import jax.numpy as jnp
from jax.experimental import pallas as pl
from jax.experimental.pallas import tpu as pltpu

EPS = float(jnp.finfo(jnp.float32).eps)

_LANES = 128
_MIN_GRID_STEPS = 8                         # keep both v7x TCs + pipeline busy
_FALLBACK_VMEM_BYTES = 64 * 1024 * 1024     # v7x per-TC physical VMEM (most conservative)


def _tpu_vmem_capacity_bytes() -> int:
    try:
        return int(pltpu.get_tpu_info().vmem_capacity_bytes)
    except Exception:
        return _FALLBACK_VMEM_BYTES


def _sublane_pack(dtype) -> int:
    # rows per packed sublane group: 8 (f32), 16 (bf16), 32 (int8/fp8)
    return max(8, 32 // jnp.dtype(dtype).itemsize)


def _round_up(x: int, m: int) -> int:
    return ((x + m - 1) // m) * m


def _pick_row_tile(n_rows: int, d: int, dtype, vmem_bytes: int, vmem_limit: int) -> int:
    """Row tile sized by native-dtype bytes streamed per step, checked against the
    double-buffered I/O + f32 working set, and clamped to keep >= _MIN_GRID_STEPS
    grid steps for large inputs."""
    pack = _sublane_pack(dtype)
    itemsize = jnp.dtype(dtype).itemsize

    if n_rows <= pack:
        return n_rows  # single block; (rows, d) equals the full array shape

    # ~1/10 of physical VMEM per streamed input tile (native dtype):
    #   128 MiB (v5e/v6e) -> ~12.8 MiB tiles, 64 MiB (v7x) -> ~6.4 MiB tiles.
    target_tile_bytes = max(pack * d * itemsize, vmem_bytes // 10)
    rows = target_tile_bytes // (d * itemsize)

    # VMEM fit: 2x double-buffered input + 2x output (native) + ~2 f32 tiles.
    per_row_vmem = 4 * d * itemsize + 2 * d * 4
    rows = min(rows, max(pack, vmem_limit // per_row_vmem))

    # Keep >= _MIN_GRID_STEPS steps so the row grid shards across v7x's two
    # TensorCores and the BlockSpec pipeline has something to prefetch.
    rows = min(rows, max(pack, pl.cdiv(n_rows, _MIN_GRID_STEPS)))

    rows = max(pack, (rows // pack) * pack)        # sublane-pack aligned
    rows = min(rows, _round_up(n_rows, pack))      # never (much) bigger than the problem
    return rows


def _rmsnorm_kernel(x_ref, g_ref, o_ref, *, scale, eps):
    # x_ref: (TR, D) tile; g_ref: (1, D) gain (f32); o_ref: (TR, D) tile.
    # Reduce from a transient f32 upcast, then re-read x_ref for the output
    # scaling so Mosaic never needs a full f32 copy of the tile live at once.
    xf = x_ref[...].astype(jnp.float32)
    ss = jnp.sum(xf * xf, axis=-1, keepdims=True)            # (TR, 1)
    inv = scale / (jnp.sqrt(ss) + eps)                       # exact; VALU/EUP have slack
    y = x_ref[...].astype(jnp.float32) * g_ref[...].astype(jnp.float32) * inv
    o_ref[...] = y.astype(o_ref.dtype)


def _rmsnorm_packed_kernel(x_ref, g_ref, m_ref, o_ref, *, scale, eps):
    # Lane-packed path for D < 128: each 128-lane row holds r = 128 // D logical
    # rows.  m_ref is a (128, 128) block-diagonal 0/1 mask; the MXU matmul gives
    # the per-segment sum of squares already broadcast across each segment's
    # lanes (the MXU is otherwise idle in this kernel).
    xf = x_ref[...].astype(jnp.float32)
    ss = jnp.dot(xf * xf, m_ref[...], preferred_element_type=jnp.float32)  # (TR, 128)
    inv = scale / (jnp.sqrt(ss) + eps)
    y = x_ref[...].astype(jnp.float32) * g_ref[...].astype(jnp.float32) * inv
    o_ref[...] = y.astype(o_ref.dtype)


def rmsnorm(x, gain, *, eps=EPS, row_tile=None):
    """x: (..., D), gain: (D,). Returns same shape/dtype as x."""
    orig_shape = x.shape
    d = orig_shape[-1]
    scale = float(d) ** 0.5

    x2 = x.reshape(-1, d)
    n_rows = x2.shape[0]
    gain_f32 = gain.astype(jnp.float32).reshape(1, d)

    vmem_bytes = _tpu_vmem_capacity_bytes()
    vmem_limit = (vmem_bytes * 3) // 4      # ~96 MiB on v5e/v6e, ~48 MiB on v7x

    params = pltpu.CompilerParams(
        dimension_semantics=("parallel",),  # shards row grid across TCs on v7x
        vmem_limit_bytes=vmem_limit,
    )

    # ---- lane-packed path (D < 128): lane-dense loads/stores --------------
    r = _LANES // d if (d < _LANES and _LANES % d == 0) else 1
    if r > 1 and n_rows % r == 0:
        n_p = n_rows // r
        x_p = x2.reshape(n_p, _LANES)                         # contiguous: free reshape
        g_p = jnp.tile(gain_f32, (1, r))                      # (1, 128)
        seg = jnp.arange(_LANES) // d
        seg_mask = (seg[:, None] == seg[None, :]).astype(jnp.float32)  # (128, 128)

        tile = row_tile if row_tile is not None else _pick_row_tile(
            n_p, _LANES, x.dtype, vmem_bytes, vmem_limit)
        kernel = functools.partial(_rmsnorm_packed_kernel, scale=scale, eps=eps)
        out = pl.pallas_call(
            kernel,
            out_shape=jax.ShapeDtypeStruct((n_p, _LANES), x.dtype),
            grid_spec=pltpu.PrefetchScalarGridSpec(
                num_scalar_prefetch=0,
                grid=(pl.cdiv(n_p, tile),),                    # ragged last block OK
                in_specs=[
                    pl.BlockSpec((tile, _LANES), lambda i: (i, 0)),
                    pl.BlockSpec((1, _LANES), lambda i: (0, 0)),       # fetched once
                    pl.BlockSpec((_LANES, _LANES), lambda i: (0, 0)),  # fetched once
                ],
                out_specs=pl.BlockSpec((tile, _LANES), lambda i: (i, 0)),
            ),
            compiler_params=params,
        )(x_p, g_p, seg_mask)
        return out.reshape(orig_shape)

    # ---- general path (D >= 128, or packing not applicable) ---------------
    # No row padding: grid = cdiv(n_rows, tile); Pallas masks the ragged last
    # block on store.  The out-of-range rows it reads may be garbage (even
    # inf/NaN after x*x) -- harmless, they never reach HBM; do not "fix" this
    # by padding, that costs a full extra HBM read+write of the tensor.
    tile = row_tile if row_tile is not None else _pick_row_tile(
        n_rows, d, x.dtype, vmem_bytes, vmem_limit)
    kernel = functools.partial(_rmsnorm_kernel, scale=scale, eps=eps)
    # TODO(synk): for D >= 128 that is not a multiple of 128, stores are still
    # lane-masked; a lane re-packing similar to the D < 128 path would help.
    out = pl.pallas_call(
        kernel,
        out_shape=jax.ShapeDtypeStruct((n_rows, d), x.dtype),
        grid_spec=pltpu.PrefetchScalarGridSpec(
            num_scalar_prefetch=0,
            grid=(pl.cdiv(n_rows, tile),),
            in_specs=[
                pl.BlockSpec((tile, d), lambda i: (i, 0)),
                pl.BlockSpec((1, d), lambda i: (0, 0)),        # gain fetched once
            ],
            out_specs=pl.BlockSpec((tile, d), lambda i: (i, 0)),
        ),
        compiler_params=params,
    )(x2, gain_f32)
    return out.reshape(orig_shape)


def rmsnorm_ref(x, gain, *, eps=EPS):
    scale = float(x.shape[-1]) ** 0.5
    xf = x.astype(jnp.float32)
    norm = jnp.sqrt(jnp.sum(xf * xf, axis=-1, keepdims=True))
    return (scale * gain.astype(jnp.float32) * xf / (norm + eps)).astype(x.dtype)


if __name__ == "__main__":
    key = jax.random.PRNGKey(0)
    k1, k2 = jax.random.split(key)

    # Primary demo: batch=2, seq=8, hidden=32 -> lane-packed path (D < 128).
    B, S, D = 2, 8, 32
    x = jax.random.normal(k1, (B, S, D), dtype=jnp.float32)
    gain = jnp.ones((D,), dtype=jnp.float32)   # matches torch.ones(dim_last)

    y = jax.block_until_ready(rmsnorm(x, gain))
    y_ref = rmsnorm_ref(x, gain)
    assert y.shape == x.shape and y.dtype == x.dtype
    assert jnp.allclose(y, y_ref, atol=1e-4, rtol=1e-4)

    # Secondary check: general path (D >= 128) with a ragged last row block
    # (15 rows, tile 8) -- exercises the no-pad masked-store path.
    x2 = jax.random.normal(k2, (3, 5, 256), dtype=jnp.float32)
    gain2 = jnp.ones((256,), dtype=jnp.float32)
    y2 = jax.block_until_ready(rmsnorm(x2, gain2))
    assert jnp.allclose(y2, rmsnorm_ref(x2, gain2), atol=1e-4, rtol=1e-4)

    print("KERNEL_OK")
</pallas_src>

<mosaic_0001>
module attributes {stable_mosaic.version = 11 : i64} {
  func.func @_rmsnorm_packed_kernel(%arg0: i32, %arg1: memref<4x128xf32, #tpu.memory_space<vmem>>, %arg2: memref<1x128xf32, #tpu.memory_space<vmem>>, %arg3: memref<128x128xf32, #tpu.memory_space<vmem>>, %arg4: memref<4x128xf32, #tpu.memory_space<vmem>>) attributes {dimension_semantics = [#tpu.dimension_semantics<parallel>], iteration_bounds = array<i64: 1>, scalar_prefetch = 0 : i64, scratch_operands = 0 : i64, tpu.core_type = #tpu.core_type<tc>, window_params = [{transform_indices = @transform_0, window_bounds = array<i64: 4, 128>}, {pipeline_mode = #tpu.pipeline_mode<synchronous>, transform_indices = @transform_1, window_bounds = array<i64: 1, 128>}, {pipeline_mode = #tpu.pipeline_mode<synchronous>, transform_indices = @transform_2, window_bounds = array<i64: 128, 128>}, {transform_indices = @transform_3, window_bounds = array<i64: 4, 128>}]} {
    %c0 = arith.constant 0 : index
    %c0_0 = arith.constant 0 : index
    %0 = vector.load %arg1[%c0, %c0_0] : memref<4x128xf32, #tpu.memory_space<vmem>>, vector<4x128xf32>
    %1 = arith.mulf %0, %0 : vector<4x128xf32>
    %c0_1 = arith.constant 0 : index
    %c0_2 = arith.constant 0 : index
    %2 = vector.load %arg3[%c0_1, %c0_2] : memref<128x128xf32, #tpu.memory_space<vmem>>, vector<128x128xf32>
    %cst = arith.constant dense<0.000000e+00> : vector<4x128xf32>
    %3 = tpu.matmul %1, %2, %cst {dimension_numbers = #tpu.dot_dimension_numbers<[1], [0], [0], [1], [0, 0, 1, 1], [], []>} : vector<4x128xf32>, vector<128x128xf32>, vector<4x128xf32> -> vector<4x128xf32>
    %4 = math.sqrt %3 : vector<4x128xf32>
    %cst_3 = arith.constant 1.1920929E-7 : f32
    %5 = vector.broadcast %cst_3 : f32 to vector<4x128xf32>
    %6 = arith.addf %4, %5 : vector<4x128xf32>
    %cst_4 = arith.constant 5.65685415 : f32
    %7 = vector.broadcast %cst_4 : f32 to vector<4x128xf32>
    %8 = arith.divf %7, %6 : vector<4x128xf32>
    %c0_5 = arith.constant 0 : index
    %c0_6 = arith.constant 0 : index
    %9 = vector.load %arg1[%c0_5, %c0_6] : memref<4x128xf32, #tpu.memory_space<vmem>>, vector<4x128xf32>
    %c0_7 = arith.constant 0 : index
    %c0_8 = arith.constant 0 : index
    %10 = vector.load %arg2[%c0_7, %c0_8] : memref<1x128xf32, #tpu.memory_space<vmem>>, vector<1x128xf32>
    %11 = vector.broadcast %10 : vector<1x128xf32> to vector<4x128xf32>
    %12 = arith.mulf %9, %11 : vector<4x128xf32>
    %13 = arith.mulf %12, %8 : vector<4x128xf32>
    %c0_9 = arith.constant 0 : index
    %c0_10 = arith.constant 0 : index
    %14 = vector.load %arg4[%c0_9, %c0_10] : memref<4x128xf32, #tpu.memory_space<vmem>>, vector<4x128xf32>
    tpu.vector_store %arg4[%c0_9, %c0_10], %13 {strides = array<i32>} : memref<4x128xf32, #tpu.memory_space<vmem>>, vector<4x128xf32>,
    return
  }
  func.func @transform_0(%arg0: i32) -> (i32, i32) {
    %c0_i32 = arith.constant 0 : i32
    %c0_i32_0 = arith.constant 0 : i32
    return %arg0, %c0_i32 : i32, i32
  }
  func.func @transform_1(%arg0: i32) -> (i32, i32) {
    %c0_i32 = arith.constant 0 : i32
    %c0_i32_0 = arith.constant 0 : i32
    %c0_i32_1 = arith.constant 0 : i32
    return %c0_i32, %c0_i32_0 : i32, i32
  }
  func.func @transform_2(%arg0: i32) -> (i32, i32) {
    %c0_i32 = arith.constant 0 : i32
    %c0_i32_0 = arith.constant 0 : i32
    %c0_i32_1 = arith.constant 0 : i32
    return %c0_i32, %c0_i32_0 : i32, i32
  }
  func.func @transform_3(%arg0: i32) -> (i32, i32) {
    %c0_i32 = arith.constant 0 : i32
    %c0_i32_0 = arith.constant 0 : i32
    return %arg0, %c0_i32 : i32, i32
  }
}

</mosaic_0001>

<bundles_post_ra>
// kernel: tpu_custom_call.1
= control target key start
LH: loop header
LB: loop body
LE: loop exit
PB: predicated region body
PF: predicated region fallthrough
CT: control target
= control target key end

     0   :  { %8 = vsyncpa [#allocation3], 0  ;;  %s334_s0 = inlined_call_operand.hbm [shape: f32[4,128], index: 0, kind: input, shape index: {}]   ;;  %s335_s1 = inlined_call_operand.vmem [shape: f32[1,128], index: 1, kind: input, shape index: {}]   ;;  %s336_s2 = inlined_call_operand.hbm [shape: f32[128,128], index: 2, kind: input, shape index: {}]   ;;  %s337_s3 = inlined_call_operand.hbm [shape: f32[4,128], index: 3, kind: output, shape index: {}]  }
   0x1   :  { %9 = vsyncpa [#allocation6], 0 }
   0x2   :  { %10 = vsyncpa [#allocation4], 0  ;;  %s295_s12 = smov [#allocation2]   ;;  %s296_s14 = smov [#allocation5]  }
   0x3   :  { %s17_s13 = sshll.u32 %s295_s12, 4  ;;  %s28_s15 = sshll.u32 %s296_s14, 4  ;;  %s18_s13 = int_to_ptr.vmem [resolvable:$true] %s17_s13  ;;  %s29_s15 = int_to_ptr.vmem [resolvable:$true] %s28_s15 }
   0x4   :  { %s237_s16 = scalar_lea.vmem %s18_s13, 64  ;;  %p242_p1 = scmp.lt.s32.totalorder %s18_s13, %s18_s13 }
   0x5   :  { %p238_p0 = scmp.ne.s32.totalorder %s18_s13, %s237_s16  ;;  %p243_p2 = scmp.lt.s32.totalorder %s237_s16, %s237_s16 }
   0x7   :  { %p244_p3 = por %p243_p2, %p242_p1 }
   0x9   :  { %p245_p4 = pnand %p244_p3, %p238_p0 }
   0xb   :  { %248 = shalt.err (!%p245_p4)
}
   0xc   :  { %20 = dma.hbm_to_vmem [thread:$0]  %s334_s0, 64, %s18_s13, [#allocation3]  }
   0xd   :  { %s257_s19 = scalar_lea.vmem %s29_s15, 2048  ;;  %p262_p6 = scmp.lt.s32.totalorder %s29_s15, %s29_s15 }
   0xe   :  { %p258_p5 = scmp.ne.s32.totalorder %s29_s15, %s257_s19  ;;  %p263_p7 = scmp.lt.s32.totalorder %s257_s19, %s257_s19 }
  0x10   :  { %p264_p8 = por %p263_p7, %p262_p6 }
  0x12   :  { %p265_p9 = pnand %p264_p8, %p258_p5 }
  0x14   :  { %268 = shalt.err (!%p265_p9)
}
  0x15   :  { %s297_s20 = smov 128   ;;  %s298_s21 = smov 8  }
  0x16   :  { %34 = dma.hbm_to_vmem [thread:$0]  %s336_s2, 2048, %s29_s15, [#allocation6], %s297_s20, %s297_s20, %s298_s21  }
  0x17   :  { %289 = dma.done.wait [#allocation3], 64  }
  0x18   :  { %290 = vsyncadd [#allocation3], 4294967232 }
  0x19   :  { %291 = dma.done.wait [#allocation6], 2048  }
  0x1a   :  { %292 = vsyncadd [#allocation6], 4294965248  ;;  %v299_v0 = vmov 0.0   ;;  %vm300_vm0 = vmmov 0   ;;  %v58_v1 = vld [vmem:[#allocation5 + $0x78] sm:$0xff]  ;;  %v57_v2 = vld [vmem:[#allocation5 + $0x70] sm:$0xff] }
  0x1b   :  { %183 = vmatprep.subr.mxu0 %v299_v0  ;;  %215 = vmatprep.mubr.msk.f32.mxu0 %vm300_vm0, %v299_v0  ;;  %v56_v3 = vld [vmem:[#allocation5 + $0x68] sm:$0xff]  ;;  %v55_v4 = vld [vmem:[#allocation5 + $0x60] sm:$0xff]  ;;  %v54_v5 = vld [vmem:[#allocation5 + $0x58] sm:$0xff]  ;;  %s301_s24 = smov [#allocation7]  }
  0x1c   :  { %184 = vmatpush3.msra.mxu0 %v58_v1  ;;  %v53_v6 = vld [vmem:[#allocation5 + $0x50] sm:$0xff]  ;;  %v52_v7 = vld [vmem:[#allocation5 + $0x48] sm:$0xff]  ;;  %v51_v8 = vld [vmem:[#allocation5 + $0x40] sm:$0xff]  ;;  %s155_s25 = sshll.u32 %s301_s24, 4  ;;  %s156_s25 = int_to_ptr.vmem [resolvable:$true] %s155_s25 }
  0x1d   :  { %185 = vmatprep.subr.mxu0 %v299_v0  ;;  %v50_v9 = vld [vmem:[#allocation5 + $0x38] sm:$0xff]  ;;  %v49_v10 = vld [vmem:[#allocation5 + $0x30] sm:$0xff]  ;;  %v48_v11 = vld [vmem:[#allocation5 + $0x28] sm:$0xff]  ;;  %s269_s26 = scalar_lea.vmem %s156_s25, 64  ;;  %p274_p11 = scmp.lt.s32.totalorder %s156_s25, %s156_s25 }
  0x1e   :  { %186 = vmatpush3.msra.mxu0 %v57_v2  ;;  %v47_v12 = vld [vmem:[#allocation5 + $0x20] sm:$0xff]  ;;  %v46_v13 = vld [vmem:[#allocation5 + $0x18] sm:$0xff]  ;;  %v45_v14 = vld [vmem:[#allocation5 + $0x10] sm:$0xff]  ;;  %p270_p10 = scmp.ne.s32.totalorder %s156_s25, %s269_s26  ;;  %p275_p12 = scmp.lt.s32.totalorder %s269_s26, %s269_s26 }
  0x1f   :  { %187 = vmatprep.subr.mxu0 %v299_v0  ;;  %v41_v15 = vld [vmem:[#allocation2] sm:$0xf]  ;;  %v44_v16 = vld [vmem:[#allocation5 + $0x8] sm:$0xff]  ;;  %v43_v17 = vld [vmem:[#allocation5] sm:$0xff] }
  0x20   :  { %188 = vmatpush3.msra.mxu0 %v56_v3  ;;  %v42_v18 = vmul.f32 %v41_v15, %v41_v15  ;;  %v165_v27 = vld [vmem:[%s335_s1] ss:$0 sm:$0xff]  ;;  %p276_p13 = por %p275_p12, %p274_p11 }
  0x21   :  { %189 = vmatprep.subr.mxu0 %v299_v0  ;;  %v146_v28 = vmul.f32 %v165_v27, %v41_v15 }
  0x22   :  { %190 = vmatpush3.msra.mxu0 %v55_v4  ;;  %p277_p0 = pnand %p276_p13, %p270_p10 }
  0x23   :  { %191 = vmatprep.subr.mxu0 %v299_v0 }
  0x24   :  { %192 = vmatpush3.msra.mxu0 %v54_v5 }
  0x25   :  { %193 = vmatprep.subr.mxu0 %v299_v0 }
  0x26   :  { %194 = vmatpush3.msra.mxu0 %v53_v6 }
  0x27   :  { %195 = vmatprep.subr.mxu0 %v299_v0 }
  0x28   :  { %196 = vmatpush3.msra.mxu0 %v52_v7 }
  0x29   :  { %197 = vmatprep.subr.mxu0 %v299_v0 }
  0x2a   :  { %198 = vmatpush3.msra.mxu0 %v51_v8 }
  0x2b   :  { %199 = vmatprep.subr.mxu0 %v299_v0 }
  0x2c   :  { %200 = vmatpush3.msra.mxu0 %v50_v9 }
  0x2d   :  { %201 = vmatprep.subr.mxu0 %v299_v0 }
  0x2e   :  { %202 = vmatpush3.msra.mxu0 %v49_v10 }
  0x2f   :  { %203 = vmatprep.subr.mxu0 %v299_v0 }
  0x30   :  { %204 = vmatpush3.msra.mxu0 %v48_v11 }
  0x31   :  { %205 = vmatprep.subr.mxu0 %v299_v0 }
  0x32   :  { %206 = vmatpush3.msra.mxu0 %v47_v12 }
  0x33   :  { %207 = vmatprep.subr.mxu0 %v299_v0 }
  0x34   :  { %208 = vmatpush3.msra.mxu0 %v46_v13 }
  0x35   :  { %209 = vmatprep.subr.mxu0 %v299_v0 }
  0x36   :  { %210 = vmatpush3.msra.mxu0 %v45_v14 }
  0x37   :  { %211 = vmatprep.subr.mxu0 %v299_v0 }
  0x38   :  { %212 = vmatpush3.msra.mxu0 %v44_v16 }
  0x39   :  { %213 = vmatprep.subr.mxu0 %v299_v0 }
  0x3a   :  { %214 = vmatpush3.msra.mxu0 %v43_v17 }
  0x3b   :  { %216 = vmatmul.mubr.f32.vlgmr.msra.gmra.mxu0 %v42_v18 }
  0xfb   :  { %v125_v19 = vpop.f32.mrf.mxu0 }
  0xfc   :  { %225 = vrsqrt.f32 %v125_v19  ;;  %vm131_vm1 = vcmp.eq.f32.partialorder %v125_v19, inf  ;;  %v134_v23 = vand.u32 2147483648, %v125_v19  ;;  %vm133_vm2 = vcmp.eq.f32.partialorder %v125_v19, 0.0 }
  0xfd   :  { %v217_v20 = vpop.f32.mrf.mxu0 }
 0x109   :  { %v226_v21 = vpop.eup %225 }
 0x10a   :  { %v130_v22 = vmul.f32 %v226_v21, %v125_v19 }
 0x10c   :  { %v132_v24 = vsel %vm131_vm1, %v125_v19, %v130_v22 }
 0x10d   :  { %v135_v25 = vsel %vm133_vm2, %v134_v23, %v132_v24 }
 0x10e   :  { %v136_v26 = vadd.f32 1.1920929e-07, %v135_v25 }
 0x110   :  { %227 = vrcp.f32 %v136_v26 }
 0x11d   :  { %v228_v29 = vpop.eup %227 }
 0x11e   :  { %v138_v30 = vmul.f32 5.656854, %v228_v29 }
 0x120   :  { %v147_v31 = vmul.f32 %v146_v28, %v138_v30 }
 0x122   :  { %148 = vst [vmem:[#allocation7] sm:$0xf] %v147_v31 }
 0x123   :  { %280 = shalt.err (!%p277_p0)
}
 0x124   :  { %158 = dma.vmem_to_hbm [thread:$0]  %s156_s25, 64, %s337_s3, [#allocation4]  }
 0x125   :  { %293 = dma.done.wait [#allocation4], 64  }
 0x126   :  { %294 = vsyncadd [#allocation4], 4294967232 }
 0x127   :  { %162 = vsyncpa [#allocation3], 1 }
 0x128   :  { %163 = vsyncpa [#allocation6], 1 }
 0x129   :  { %164 = vsyncpa [#allocation4], 1 }

</bundles_post_ra>
